<compile_context>
chip_gen: v7x
topology: tpu7x:2x2x1
jax: 0.10.0
libtpu: 0.0.40
codegen_flags: <defaults>
</compile_context>

<pallas_src>
import jax
import jax.numpy as jnp
from jax.experimental import pallas as pl
from jax.experimental.pallas import tpu as pltpu


def _round_up(x, m):
    return (x + m - 1) // m * m


def _tpu_generation():
    """Best-effort chip detection -> (tensorcores_per_chip, vmem_cap_bytes)."""
    kind = ""
    try:
        kind = jax.devices()[0].device_kind.lower()
    except Exception:
        pass
    if "v7" in kind:
        return 2, 48 * 1024 * 1024      # v7x: 2 TC/chip, 64 MiB VMEM/TC
    if "v5" in kind or "v6" in kind:
        return 1, 100 * 1024 * 1024     # v5e/v6e: 1 TC/chip, 128 MiB VMEM
    if "v4" in kind or "v3" in kind:
        return 2, 96 * 1024 * 1024
    return 1, 48 * 1024 * 1024          # unknown: conservative


def prepare_bn_classifier_params(bn_weight, bn_bias, running_mean, running_var,
                                 cls_weight, *, eps=1e-5,
                                 matmul_dtype=jnp.bfloat16):
    """Fold eval-mode BN into (scale, shift) and pre-transpose/cast the weight.

    Call ONCE outside the per-step forward so the weight transpose + cast
    (a full HBM read+write of the weight) is not paid on every call.
    """
    scale = (bn_weight.astype(jnp.float32)
             * jax.lax.rsqrt(running_var.astype(jnp.float32) + float(eps)))
    shift = bn_bias.astype(jnp.float32) - running_mean.astype(jnp.float32) * scale
    wt = cls_weight.T.astype(matmul_dtype)            # (K, N)
    return scale.reshape(1, -1), shift.reshape(1, -1), wt


def _bn_classifier_kernel(x_ref, scale_ref, shift_ref, wt_ref,
                          feat_ref, score_ref):
    """One (batch-tile, N-tile) step.

    x_ref     : (tm, K)  input rows
    scale_ref : (1,  K)  folded BN scale (f32, VMEM-resident)
    shift_ref : (1,  K)  folded BN shift (f32, VMEM-resident)
    wt_ref    : (K, tn)  classifier weight slab (bf16)
    feat_ref  : (tm, K)  BN output            (written on first N step only)
    score_ref : (tm, tn) classifier logits
    """
    j = pl.program_id(1)

    x = x_ref[...].astype(jnp.float32)                 # (tm, K)
    feat = x * scale_ref[...] + shift_ref[...]         # VPU, f32

    @pl.when(j == 0)
    def _():
        feat_ref[...] = feat.astype(feat_ref.dtype)    # one full-tile store

    score = jnp.dot(feat.astype(wt_ref.dtype), wt_ref[...],
                    preferred_element_type=jnp.float32)
    score_ref[...] = score.astype(score_ref.dtype)     # one full-tile store


def bn_classifier_forward(x, scale, shift, wt, *, max_tile_m=None,
                          weight_block_bytes=8 * 1024 * 1024):
    """JAX/Pallas BNClassifier.forward (eval-mode BN), using folded params.

    x     : (M, K) input features
    scale : (1, K) f32 folded BN scale
    shift : (1, K) f32 folded BN shift
    wt    : (K, N) classifier weight, pre-transposed (typically bf16)
    returns (feature (M, K) in x.dtype, cls_score (M, N) in x.dtype)
    """
    M, K = x.shape
    Kw, N = wt.shape
    assert Kw == K, "classifier weight in_dim mismatch"

    out_dtype = x.dtype
    num_cores, vmem_cap = _tpu_generation()

    # ---- pad to lane/sublane-friendly sizes (no-op when already aligned) ----
    Mp = _round_up(M, 8)
    Kp = _round_up(K, 128)
    Np = _round_up(N, 128)
    if (Mp, Kp) != (M, K):
        x = jnp.pad(x, ((0, Mp - M), (0, Kp - K)))
    if Kp != K:
        scale = jnp.pad(scale, ((0, 0), (0, Kp - K)))
        shift = jnp.pad(shift, ((0, 0), (0, Kp - K)))
    if (Kp, Np) != (K, N):
        wt = jnp.pad(wt, ((0, Kp - K), (0, Np - N)))

    x_itemsize = jnp.dtype(x.dtype).itemsize
    wt_itemsize = jnp.dtype(wt.dtype).itemsize
    out_itemsize = jnp.dtype(out_dtype).itemsize

    # ---- N tiling: keep the weight slab under a VMEM budget ----
    if Kp * Np * wt_itemsize <= weight_block_bytes:
        tn = Np
    else:
        tn = max(256, (weight_block_bytes // (Kp * wt_itemsize)) // 256 * 256)
        tn = min(tn, Np)
    grid_n = pl.cdiv(Np, tn)

    # ---- M tiling: generation aware ----
    if max_tile_m is None:
        max_tile_m = 1024 if num_cores == 1 else 512
    if num_cores > 1 and Mp >= num_cores * 128:
        tm = _round_up(pl.cdiv(Mp, num_cores), 8)      # one big tile per TC
    else:
        tm = Mp                                        # single grid step
    tm = max(8, min(tm, _round_up(max_tile_m, 8), Mp))
    grid_m = pl.cdiv(Mp, tm)

    # ---- VMEM budget (never below the actual block footprint) ----
    wt_bufs = 2 if grid_n > 1 else 1
    vmem_needed = (2 * tm * Kp * x_itemsize            # x (double-buffered)
                   + 2 * tm * Kp * out_itemsize        # feature
                   + 2 * tm * tn * out_itemsize        # score
                   + wt_bufs * Kp * tn * wt_itemsize   # weight slab
                   + 2 * 2 * Kp * 4                    # scale + shift (f32)
                   + tm * tn * 4)                      # accumulator headroom
    vmem_limit = int(min(max(vmem_needed + (2 << 20), 16 << 20), vmem_cap))
    vmem_limit = max(vmem_limit, vmem_needed + (1 << 20))

    cost = pl.CostEstimate(
        flops=2 * Mp * Kp * Np + 2 * Mp * Kp,
        transcendentals=0,
        bytes_accessed=(Mp * Kp * x_itemsize
                        + 2 * Kp * 4
                        + Kp * Np * wt_itemsize
                        + Mp * Kp * out_itemsize
                        + Mp * Np * out_itemsize),
    )

    def _build(single_buffer_consts):
        def const_spec(shape):
            if single_buffer_consts:
                return pl.BlockSpec(shape, lambda i, j: (0, 0),
                                    pipeline_mode=pl.Buffered(1))
            return pl.BlockSpec(shape, lambda i, j: (0, 0))

        if grid_n == 1:
            wt_spec = const_spec((Kp, tn))
        else:
            wt_spec = pl.BlockSpec((Kp, tn), lambda i, j: (0, j))

        return pl.pallas_call(
            _bn_classifier_kernel,
            out_shape=(jax.ShapeDtypeStruct((Mp, Kp), out_dtype),
                       jax.ShapeDtypeStruct((Mp, Np), out_dtype)),
            grid_spec=pltpu.PrefetchScalarGridSpec(
                num_scalar_prefetch=0,
                grid=(grid_m, grid_n),
                in_specs=[
                    pl.BlockSpec((tm, Kp), lambda i, j: (i, 0)),   # x tile
                    const_spec((1, Kp)),                           # scale
                    const_spec((1, Kp)),                           # shift
                    wt_spec,                                       # W^T slab
                ],
                out_specs=[
                    pl.BlockSpec((tm, Kp), lambda i, j: (i, 0)),   # feature
                    pl.BlockSpec((tm, tn), lambda i, j: (i, j)),   # cls_score
                ],
            ),
            compiler_params=pltpu.CompilerParams(
                dimension_semantics=("parallel", "arbitrary"),
                vmem_limit_bytes=vmem_limit,
            ),
            cost_estimate=cost,
        )

    try:
        feature, cls_score = jax.block_until_ready(_build(True)(x, scale, shift, wt))
    except Exception:
        # pipeline_mode=pl.Buffered(1) unsupported on this jax version: fall back.
        feature, cls_score = _build(False)(x, scale, shift, wt)

    if Mp != M or Kp != K:
        feature = feature[:M, :K]
    if Mp != M or Np != N:
        cls_score = cls_score[:M, :N]
    return feature, cls_score


if __name__ == "__main__":
    # Shapes consistent with the module: in_dim = 256, class_num = 128, batch = 64.
    batch = 64
    in_dim = 256
    class_num = 128
    eps = 1e-5
    dtype = jnp.float32

    key = jax.random.PRNGKey(0)
    k_x, k_w, k_g, k_m, k_v = jax.random.split(key, 5)

    x = jax.random.normal(k_x, (batch, in_dim), dtype=dtype)

    # _init_params(): BN weight=1, BN bias=0 (frozen); Linear weight ~ N(0, 0.001).
    # Use perturbed "trained" running stats / gamma so BN math is exercised.
    bn_weight = (1.0 + 0.1 * jax.random.normal(k_g, (in_dim,))).astype(dtype)
    bn_bias = jnp.zeros((in_dim,), dtype)
    running_mean = (0.5 * jax.random.normal(k_m, (in_dim,))).astype(dtype)
    running_var = (1.0 + 0.5 * jax.random.uniform(k_v, (in_dim,))).astype(dtype)
    cls_weight = (0.001 * jax.random.normal(k_w, (class_num, in_dim))).astype(dtype)

    # One-time parameter preparation (BN fold + weight transpose/bf16 cast).
    scale, shift, wt = prepare_bn_classifier_params(
        bn_weight, bn_bias, running_mean, running_var, cls_weight, eps=eps)

    feature, cls_score = bn_classifier_forward(x, scale, shift, wt)
    feature, cls_score = jax.block_until_ready((feature, cls_score))

    # Plain-JAX reference of the module semantics (eval-mode BN + linear, f32).
    scale_ref = bn_weight * jax.lax.rsqrt(running_var + eps)
    shift_ref = bn_bias - running_mean * scale_ref
    feature_ref = x * scale_ref[None, :] + shift_ref[None, :]
    score_ref = jnp.dot(feature_ref, cls_weight.T,
                        preferred_element_type=jnp.float32)

    assert feature.shape == (batch, in_dim)
    assert cls_score.shape == (batch, class_num)
    assert feature.dtype == dtype and cls_score.dtype == dtype
    # Feature path is pure f32 -> tight tolerance.
    assert jnp.allclose(feature, feature_ref, rtol=1e-5, atol=1e-6)
    # Classifier matmul uses bf16 operands with f32 accumulation -> looser.
    assert jnp.allclose(cls_score, score_ref, rtol=2e-2, atol=1e-3)

    print("KERNEL_OK")
</pallas_src>

<mosaic_0001>
module attributes {stable_mosaic.version = 11 : i64} {
  func.func @_bn_classifier_kernel(%arg0: i32, %arg1: i32, %arg2: memref<64x256xf32, #tpu.memory_space<vmem>>, %arg3: memref<1x256xf32, #tpu.memory_space<vmem>>, %arg4: memref<1x256xf32, #tpu.memory_space<vmem>>, %arg5: memref<256x128xbf16, #tpu.memory_space<vmem>>, %arg6: memref<64x256xf32, #tpu.memory_space<vmem>>, %arg7: memref<64x128xf32, #tpu.memory_space<vmem>>) attributes {dimension_semantics = [#tpu.dimension_semantics<parallel>, #tpu.dimension_semantics<arbitrary>], iteration_bounds = array<i64: 1, 1>, scalar_prefetch = 0 : i64, scratch_operands = 0 : i64, tpu.core_type = #tpu.core_type<tc>, window_params = [{transform_indices = @transform_0, window_bounds = array<i64: 64, 256>}, {pipeline_mode = #tpu.pipeline_mode<synchronous>, transform_indices = @transform_1, window_bounds = array<i64: 1, 256>}, {pipeline_mode = #tpu.pipeline_mode<synchronous>, transform_indices = @transform_2, window_bounds = array<i64: 1, 256>}, {pipeline_mode = #tpu.pipeline_mode<synchronous>, transform_indices = @transform_3, window_bounds = array<i64: 256, 128>}, {transform_indices = @transform_4, window_bounds = array<i64: 64, 256>}, {transform_indices = @transform_5, window_bounds = array<i64: 64, 128>}]} {
    %c0 = arith.constant 0 : index
    %c0_0 = arith.constant 0 : index
    %0 = vector.load %arg2[%c0, %c0_0] : memref<64x256xf32, #tpu.memory_space<vmem>>, vector<64x256xf32>
    %c0_1 = arith.constant 0 : index
    %c0_2 = arith.constant 0 : index
    %1 = vector.load %arg3[%c0_1, %c0_2] : memref<1x256xf32, #tpu.memory_space<vmem>>, vector<1x256xf32>
    %2 = vector.broadcast %1 : vector<1x256xf32> to vector<64x256xf32>
    %3 = arith.mulf %0, %2 : vector<64x256xf32>
    %c0_3 = arith.constant 0 : index
    %c0_4 = arith.constant 0 : index
    %4 = vector.load %arg4[%c0_3, %c0_4] : memref<1x256xf32, #tpu.memory_space<vmem>>, vector<1x256xf32>
    %5 = vector.broadcast %4 : vector<1x256xf32> to vector<64x256xf32>
    %6 = arith.addf %3, %5 : vector<64x256xf32>
    %c0_i32 = arith.constant 0 : i32
    %7 = arith.cmpi eq, %arg1, %c0_i32 : i32
    %8 = arith.extui %7 : i1 to i32
    %c0_i32_5 = arith.constant 0 : i32
    %9 = arith.cmpi ne, %8, %c0_i32_5 : i32
    scf.if %9 {
      %c0_10 = arith.constant 0 : index
      %c0_11 = arith.constant 0 : index
      %14 = vector.load %arg6[%c0_10, %c0_11] : memref<64x256xf32, #tpu.memory_space<vmem>>, vector<64x256xf32>
      tpu.vector_store %arg6[%c0_10, %c0_11], %6 {strides = array<i32>} : memref<64x256xf32, #tpu.memory_space<vmem>>, vector<64x256xf32>,
    } else {
    }
    %10 = arith.truncf %6 : vector<64x256xf32> to vector<64x256xbf16>
    %c0_6 = arith.constant 0 : index
    %c0_7 = arith.constant 0 : index
    %11 = vector.load %arg5[%c0_6, %c0_7] : memref<256x128xbf16, #tpu.memory_space<vmem>>, vector<256x128xbf16>
    %cst = arith.constant dense<0.000000e+00> : vector<64x128xf32>
    %12 = tpu.matmul %10, %11, %cst {dimension_numbers = #tpu.dot_dimension_numbers<[1], [0], [0], [1], [0, 0, 1, 1], [], []>} : vector<64x256xbf16>, vector<256x128xbf16>, vector<64x128xf32> -> vector<64x128xf32>
    %c0_8 = arith.constant 0 : index
    %c0_9 = arith.constant 0 : index
    %13 = vector.load %arg7[%c0_8, %c0_9] : memref<64x128xf32, #tpu.memory_space<vmem>>, vector<64x128xf32>
    tpu.vector_store %arg7[%c0_8, %c0_9], %12 {strides = array<i32>} : memref<64x128xf32, #tpu.memory_space<vmem>>, vector<64x128xf32>,
    return
  }
  func.func @transform_0(%arg0: i32, %arg1: i32) -> (i32, i32) {
    %c0_i32 = arith.constant 0 : i32
    %c0_i32_0 = arith.constant 0 : i32
    return %arg0, %c0_i32 : i32, i32
  }
  func.func @transform_1(%arg0: i32, %arg1: i32) -> (i32, i32) {
    %c0_i32 = arith.constant 0 : i32
    %c0_i32_0 = arith.constant 0 : i32
    %c0_i32_1 = arith.constant 0 : i32
    return %c0_i32, %c0_i32_0 : i32, i32
  }
  func.func @transform_2(%arg0: i32, %arg1: i32) -> (i32, i32) {
    %c0_i32 = arith.constant 0 : i32
    %c0_i32_0 = arith.constant 0 : i32
    %c0_i32_1 = arith.constant 0 : i32
    return %c0_i32, %c0_i32_0 : i32, i32
  }
  func.func @transform_3(%arg0: i32, %arg1: i32) -> (i32, i32) {
    %c0_i32 = arith.constant 0 : i32
    %c0_i32_0 = arith.constant 0 : i32
    %c0_i32_1 = arith.constant 0 : i32
    return %c0_i32, %c0_i32_0 : i32, i32
  }
  func.func @transform_4(%arg0: i32, %arg1: i32) -> (i32, i32) {
    %c0_i32 = arith.constant 0 : i32
    %c0_i32_0 = arith.constant 0 : i32
    return %arg0, %c0_i32 : i32, i32
  }
  func.func @transform_5(%arg0: i32, %arg1: i32) -> (i32, i32) {
    %c0_i32 = arith.constant 0 : i32
    return %arg0, %arg1 : i32, i32
  }
}

module attributes {stable_mosaic.version = 11 : i64} {
  func.func @_bn_classifier_kernel(%arg0: i32, %arg1: i32, %arg2: memref<64x256xf32, #tpu.memory_space<vmem>>, %arg3: memref<1x256xf32, #tpu.memory_space<vmem>>, %arg4: memref<1x256xf32, #tpu.memory_space<vmem>>, %arg5: memref<256x128xbf16, #tpu.memory_space<vmem>>, %arg6: memref<64x256xf32, #tpu.memory_space<vmem>>, %arg7: memref<64x128xf32, #tpu.memory_space<vmem>>) attributes {dimension_semantics = [#tpu.dimension_semantics<parallel>, #tpu.dimension_semantics<arbitrary>], iteration_bounds = array<i64: 1, 1>, scalar_prefetch = 0 : i64, scratch_operands = 0 : i64, tpu.core_type = #tpu.core_type<tc>, window_params = [{transform_indices = @transform_0, window_bounds = array<i64: 64, 256>}, {pipeline_mode = #tpu.pipeline_mode<synchronous>, transform_indices = @transform_1, window_bounds = array<i64: 1, 256>}, {pipeline_mode = #tpu.pipeline_mode<synchronous>, transform_indices = @transform_2, window_bounds = array<i64: 1, 256>}, {pipeline_mode = #tpu.pipeline_mode<synchronous>, transform_indices = @transform_3, window_bounds = array<i64: 256, 128>}, {transform_indices = @transform_4, window_bounds = array<i64: 64, 256>}, {transform_indices = @transform_5, window_bounds = array<i64: 64, 128>}]} {
    %c0 = arith.constant 0 : index
    %c0_0 = arith.constant 0 : index
    %0 = vector.load %arg2[%c0, %c0_0] : memref<64x256xf32, #tpu.memory_space<vmem>>, vector<64x256xf32>
    %c0_1 = arith.constant 0 : index
    %c0_2 = arith.constant 0 : index
    %1 = vector.load %arg3[%c0_1, %c0_2] : memref<1x256xf32, #tpu.memory_space<vmem>>, vector<1x256xf32>
    %2 = vector.broadcast %1 : vector<1x256xf32> to vector<64x256xf32>
    %3 = arith.mulf %0, %2 : vector<64x256xf32>
    %c0_3 = arith.constant 0 : index
    %c0_4 = arith.constant 0 : index
    %4 = vector.load %arg4[%c0_3, %c0_4] : memref<1x256xf32, #tpu.memory_space<vmem>>, vector<1x256xf32>
    %5 = vector.broadcast %4 : vector<1x256xf32> to vector<64x256xf32>
    %6 = arith.addf %3, %5 : vector<64x256xf32>
    %c0_i32 = arith.constant 0 : i32
    %7 = arith.cmpi eq, %arg1, %c0_i32 : i32
    %8 = arith.extui %7 : i1 to i32
    %c0_i32_5 = arith.constant 0 : i32
    %9 = arith.cmpi ne, %8, %c0_i32_5 : i32
    scf.if %9 {
      %c0_10 = arith.constant 0 : index
      %c0_11 = arith.constant 0 : index
      %14 = vector.load %arg6[%c0_10, %c0_11] : memref<64x256xf32, #tpu.memory_space<vmem>>, vector<64x256xf32>
      tpu.vector_store %arg6[%c0_10, %c0_11], %6 {strides = array<i32>} : memref<64x256xf32, #tpu.memory_space<vmem>>, vector<64x256xf32>,
    } else {
    }
    %10 = arith.truncf %6 : vector<64x256xf32> to vector<64x256xbf16>
    %c0_6 = arith.constant 0 : index
    %c0_7 = arith.constant 0 : index
    %11 = vector.load %arg5[%c0_6, %c0_7] : memref<256x128xbf16, #tpu.memory_space<vmem>>, vector<256x128xbf16>
    %cst = arith.constant dense<0.000000e+00> : vector<64x128xf32>
    %12 = tpu.matmul %10, %11, %cst {dimension_numbers = #tpu.dot_dimension_numbers<[1], [0], [0], [1], [0, 0, 1, 1], [], []>} : vector<64x256xbf16>, vector<256x128xbf16>, vector<64x128xf32> -> vector<64x128xf32>
    %c0_8 = arith.constant 0 : index
    %c0_9 = arith.constant 0 : index
    %13 = vector.load %arg7[%c0_8, %c0_9] : memref<64x128xf32, #tpu.memory_space<vmem>>, vector<64x128xf32>
    tpu.vector_store %arg7[%c0_8, %c0_9], %12 {strides = array<i32>} : memref<64x128xf32, #tpu.memory_space<vmem>>, vector<64x128xf32>,
    return
  }
  func.func @transform_0(%arg0: i32, %arg1: i32) -> (i32, i32) {
    %c0_i32 = arith.constant 0 : i32
    %c0_i32_0 = arith.constant 0 : i32
    return %arg0, %c0_i32 : i32, i32
  }
  func.func @transform_1(%arg0: i32, %arg1: i32) -> (i32, i32) {
    %c0_i32 = arith.constant 0 : i32
    %c0_i32_0 = arith.constant 0 : i32
    %c0_i32_1 = arith.constant 0 : i32
    return %c0_i32, %c0_i32_0 : i32, i32
  }
  func.func @transform_2(%arg0: i32, %arg1: i32) -> (i32, i32) {
    %c0_i32 = arith.constant 0 : i32
    %c0_i32_0 = arith.constant 0 : i32
    %c0_i32_1 = arith.constant 0 : i32
    return %c0_i32, %c0_i32_0 : i32, i32
  }
  func.func @transform_3(%arg0: i32, %arg1: i32) -> (i32, i32) {
    %c0_i32 = arith.constant 0 : i32
    %c0_i32_0 = arith.constant 0 : i32
    %c0_i32_1 = arith.constant 0 : i32
    return %c0_i32, %c0_i32_0 : i32, i32
  }
  func.func @transform_4(%arg0: i32, %arg1: i32) -> (i32, i32) {
    %c0_i32 = arith.constant 0 : i32
    %c0_i32_0 = arith.constant 0 : i32
    return %arg0, %c0_i32 : i32, i32
  }
  func.func @transform_5(%arg0: i32, %arg1: i32) -> (i32, i32) {
    %c0_i32 = arith.constant 0 : i32
    return %arg0, %arg1 : i32, i32
  }
}

</mosaic_0001>

<bundles_post_ra>
// kernel: tpu_custom_call.1
= control target key start
LH: loop header
LB: loop body
LE: loop exit
PB: predicated region body
PF: predicated region fallthrough
CT: control target
= control target key end

     0   :  { %11 = vsyncpa [#allocation3], 0  ;;  %s717_s0 = inlined_call_operand.hbm [shape: f32[64,256], index: 0, kind: input, shape index: {}]   ;;  %s718_s1 = inlined_call_operand.vmem [shape: f32[1,256], index: 1, kind: input, shape index: {}]   ;;  %s719_s2 = inlined_call_operand.vmem [shape: f32[1,256], index: 2, kind: input, shape index: {}]   ;;  %s720_s3 = inlined_call_operand.hbm [shape: bf16[256,128], index: 3, kind: input, shape index: {}]   ;;  %s721_s4 = inlined_call_operand.hbm [shape: f32[64,256], index: 4, kind: output, shape index: {0}]   ;;  %s722_s5 = inlined_call_operand.hbm [shape: f32[64,128], index: 5, kind: output, shape index: {1}]  }
   0x1   :  { %12 = vsyncpa [#allocation6], 0 }
   0x2   :  { %13 = vsyncpa [#allocation4], 0 }
   0x3   :  { %14 = vsyncpa [#allocation9], 0  ;;  %s579_s18 = smov [#allocation2]   ;;  %s483_s22 = scalar_lea.hbm %s717_s0, 2048 }
   0x4   :  { %s20_s19 = sshll.u32 %s579_s18, 4  ;;  %p484_p0 = scmp.ne.s32.totalorder %s717_s0, %s483_s22  ;;  %s21_s19 = int_to_ptr.vmem [resolvable:$true] %s20_s19 }
   0x5   :  { %p487_p1 = scmp.lt.u32.totalorder %s483_s22, %s717_s0 }
   0x7   :  { %p489_p2 = pnand %p487_p1, %p484_p0 }
   0x9   :  { %492 = shalt.err (!%p489_p2)
}
   0xa   :  { %s493_s27 = scalar_lea.vmem %s21_s19, 2048  ;;  %p498_p4 = scmp.lt.s32.totalorder %s21_s19, %s21_s19 }
   0xb   :  { %p494_p3 = scmp.ne.s32.totalorder %s21_s19, %s493_s27  ;;  %p499_p5 = scmp.lt.s32.totalorder %s493_s27, %s493_s27 }
   0xd   :  { %p500_p6 = por %p499_p5, %p498_p4 }
   0xf   :  { %p501_p7 = pnand %p500_p6, %p494_p3 }
  0x11   :  { %504 = shalt.err (!%p501_p7)
}
  0x12   :  { %s580_s28 = smov 256   ;;  %s581_s29 = smov 16  }
  0x13   :  { %26 = dma.hbm_to_vmem [thread:$0]  %s717_s0, 2048, %s21_s19, [#allocation3], %s580_s28, %s580_s28, %s581_s29  }
  0x14   :  { %s582_s7 = smov [#allocation5]   ;;  %s505_s11 = scalar_lea.hbm %s720_s3, 2048 }
  0x15   :  { %s36_s8 = sshll.u32 %s582_s7, 4  ;;  %p506_p8 = scmp.ne.s32.totalorder %s720_s3, %s505_s11  ;;  %s37_s8 = int_to_ptr.vmem [resolvable:$true] %s36_s8 }
  0x16   :  { %p509_p9 = scmp.lt.u32.totalorder %s505_s11, %s720_s3 }
  0x18   :  { %p511_p10 = pnand %p509_p9, %p506_p8 }
  0x1a   :  { %514 = shalt.err (!%p511_p10)
}
  0x1b   :  { %s515_s16 = scalar_lea.vmem %s37_s8, 2048  ;;  %p520_p12 = scmp.lt.s32.totalorder %s37_s8, %s37_s8 }
  0x1c   :  { %p516_p11 = scmp.ne.s32.totalorder %s37_s8, %s515_s16  ;;  %p521_p13 = scmp.lt.s32.totalorder %s515_s16, %s515_s16 }
  0x1e   :  { %p522_p0 = por %p521_p13, %p520_p12 }
  0x20   :  { %p523_p1 = pnand %p522_p0, %p516_p11 }
  0x22   :  { %526 = shalt.err (!%p523_p1)
}
  0x23   :  { %s583_s0 = smov 64   ;;  %s584_s17 = smov 4  }
  0x24   :  { %42 = dma.hbm_to_vmem [thread:$0]  %s720_s3, 2048, %s37_s8, [#allocation6], %s583_s0, %s583_s0, %s584_s17  }
  0x25   :  { %571 = dma.done.wait [#allocation3], 2048  }
  0x26   :  { %572 = vsyncadd [#allocation3], 4294965248 }
  0x27   :  { %573 = dma.done.wait [#allocation6], 2048  }
  0x28   :  { %574 = vsyncadd [#allocation6], 4294965248  ;;  %v467_v0 = vld [vmem:[#allocation5 + $0x40] sm:$0xff]   ;;  %v469_v2 = vld [vmem:[#allocation5 + $0x48] sm:$0xff]   ;;  %v68_v5 = vlaneseq }
  0x29   :  { %v468_v1 = vld [vmem:[#allocation5] sm:$0xff]   ;;  %401 = vmatprep.subr.bf16.mxu0 %v467_v0  ;;  %441 = vmatprep.subr.bf16.mxu1 %v467_v0  ;;  %v470_v3 = vld [vmem:[#allocation5 + $0x8] sm:$0xff]   ;;  %v471_v4 = vld [vmem:[#allocation5 + $0x50] sm:$0xff]  }
  0x2a   :  { %402 = vmatpush3.bf16.msra.mxu0 %v468_v1  ;;  %449 = vmatpush3.bf16.msra.mxu1 %v468_v1  ;;  %v472_v6 = vld [vmem:[#allocation5 + $0x10] sm:$0xff]   ;;  %v473_v7 = vld [vmem:[#allocation5 + $0x58] sm:$0xff]   ;;  %v69_v8 = vshrl.u32 %v68_v5, 7  ;;  %v475_v10 = vld [vmem:[#allocation5 + $0x60] sm:$0xff]  }
  0x2b   :  { %403 = vmatprep.subr.bf16.mxu0 %v469_v2  ;;  %442 = vmatprep.subr.bf16.mxu1 %v469_v2  ;;  %v474_v9 = vld [vmem:[#allocation5 + $0x18] sm:$0xff]   ;;  %v476_v13 = vld [vmem:[#allocation5 + $0x20] sm:$0xff]   ;;  %v477_v14 = vld [vmem:[#allocation5 + $0x68] sm:$0xff]  }
  0x2c   :  { %v70_v11 = vsub.s32 0, %v69_v8  ;;  %v74_v12 = vsub.s32 1, %v69_v8  ;;  %v51_v15 = vld [vmem:[#allocation2 + $0x8] sm:$0xff]  ;;  %v53_v16 = vld [vmem:[#allocation2 + $0x18] sm:$0xff]  ;;  %v66_v17 = vld [vmem:[%s718_s1] sm:$0x3] }
  0x2d   :  { %v94_v20 = vld [vmem:[%s719_s2] sm:$0x3]  ;;  %v59_v21 = vld [vmem:[#allocation2 + $0x48] sm:$0xff]  ;;  %v61_v22 = vld [vmem:[#allocation2 + $0x58] sm:$0xff]  ;;  %s585_s1 = smov [#allocation7]  }
  0x2e   :  { %404 = vmatpush3.bf16.msra.mxu0 %v470_v3  ;;  %450 = vmatpush3.bf16.msra.mxu1 %v470_v3  ;;  %v649_v18 = vrot.slane %v66_v17, %v70_v11  ;;  %v75_v19 = vrot.slane %v66_v17, %v74_v12  ;;  %v654_v23 = vrot.slane %v94_v20, %v70_v11  ;;  %v50_v25 = vld [vmem:[#allocation2] sm:$0xff]  ;;  %v52_v26 = vld [vmem:[#allocation2 + $0x10] sm:$0xff]  ;;  %v478_v28 = vld [vmem:[#allocation5 + $0x28] sm:$0xff]   ;;  %s356_s2 = sshll.u32 %s585_s1, 4  ;;  %s357_s2 = int_to_ptr.vmem [resolvable:$true] %s356_s2 }
  0x2f   :  { %405 = vmatprep.subr.bf16.mxu0 %v471_v4  ;;  %443 = vmatprep.subr.bf16.mxu1 %v471_v4  ;;  %v656_v24 = vrot.slane %v94_v20, %v74_v12  ;;  %v58_v27 = vld [vmem:[#allocation2 + $0x40] sm:$0xff]  ;;  %v60_v32 = vld [vmem:[#allocation2 + $0x50] sm:$0xff]  ;;  %v55_v37 = vld [vmem:[#allocation2 + $0x28] sm:$0xff]  ;;  %s527_s23 = scalar_lea.vmem %s357_s2, 2048  ;;  %p532_p3 = scmp.lt.s32.totalorder %s357_s2, %s357_s2 }
  0x30   :  { %v79_v29 = vmul.f32 %v75_v19, %v51_v15  ;;  %v81_v30 = vmul.f32 %v75_v19, %v53_v16  ;;  %v87_v31 = vmul.f32 %v75_v19, %v59_v21  ;;  %v479_v33 = vld [vmem:[#allocation5 + $0x70] sm:$0xff]   ;;  %v89_v34 = vmul.f32 %v75_v19, %v61_v22  ;;  %v57_v47 = vld [vmem:[#allocation2 + $0x38] sm:$0xff]  ;;  %v63_v48 = vld [vmem:[#allocation2 + $0x68] sm:$0xff]  ;;  %p528_p2 = scmp.ne.s32.totalorder %s357_s2, %s527_s23  ;;  %p533_p4 = scmp.lt.s32.totalorder %s527_s23, %s527_s23 }
  0x31   :  { %v78_v35 = vmul.f32 %v649_v18, %v50_v25  ;;  %v80_v36 = vmul.f32 %v649_v18, %v52_v26  ;;  %v480_v38 = vld [vmem:[#allocation5 + $0x30] sm:$0xff]   ;;  %v86_v42 = vmul.f32 %v649_v18, %v58_v27  ;;  %v88_v46 = vmul.f32 %v649_v18, %v60_v32  ;;  %v65_v49 = vld [vmem:[#allocation2 + $0x78] sm:$0xff]  ;;  %v54_v53 = vld [vmem:[#allocation2 + $0x20] sm:$0xff] }
  0x32   :  { %406 = vmatpush3.bf16.msra.mxu0 %v472_v6  ;;  %451 = vmatpush3.bf16.msra.mxu1 %v472_v6  ;;  %v107_v39 = vadd.f32 %v656_v24, %v79_v29  ;;  %v109_v40 = vadd.f32 %v656_v24, %v81_v30  ;;  %v115_v41 = vadd.f32 %v656_v24, %v87_v31  ;;  %v56_v54 = vld [vmem:[#allocation2 + $0x30] sm:$0xff]  ;;  %v62_v55 = vld [vmem:[#allocation2 + $0x60] sm:$0xff]  ;;  %v481_v56 = vld [vmem:[#allocation5 + $0x78] sm:$0xff]   ;;  %p534_p5 = por %p533_p4, %p532_p3 }
  0x33   :  { %407 = vmatprep.subr.bf16.mxu0 %v473_v7  ;;  %444 = vmatprep.subr.bf16.mxu1 %v473_v7  ;;  %v117_v43 = vadd.f32 %v656_v24, %v89_v34  ;;  %v666_v44 = vadd.f32 %v654_v23, %v78_v35  ;;  %v669_v45 = vadd.f32 %v654_v23, %v80_v36  ;;  %v64_v63 = vld [vmem:[#allocation2 + $0x70] sm:$0xff]  ;;  %v482_v3 = vld [vmem:[#allocation5 + $0x38] sm:$0xff]  }
  0x34   :  { %127 = vst [vmem:[#allocation7 + $0x8] sm:$0xff] %v107_v39  ;;  %129 = vst [vmem:[#allocation7 + $0x18] sm:$0xff] %v109_v40  ;;  %v143_v50 = vpack.c.bf16 %v109_v40, %v107_v39  ;;  %v114_v51 = vadd.f32 %v654_v23, %v86_v42  ;;  %v83_v52 = vmul.f32 %v75_v19, %v55_v37  ;;  %p535_p6 = pnand %p534_p5, %p528_p2 }
  0x35   :  { %135 = vst [vmem:[#allocation7 + $0x48] sm:$0xff] %v115_v41  ;;  %137 = vst [vmem:[#allocation7 + $0x58] sm:$0xff] %v117_v43  ;;  %v147_v57 = vpack.c.bf16 %v117_v43, %v115_v41  ;;  %v116_v58 = vadd.f32 %v654_v23, %v88_v46  ;;  %v85_v59 = vmul.f32 %v75_v19, %v57_v47 }
  0x36   :  { %408 = vmatpush3.bf16.msra.mxu0 %v474_v9  ;;  %452 = vmatpush3.bf16.msra.mxu1 %v474_v9  ;;  %126 = vst [vmem:[#allocation7] sm:$0xff] %v666_v44  ;;  %128 = vst [vmem:[#allocation7 + $0x10] sm:$0xff] %v669_v45  ;;  %v111_v60 = vadd.f32 %v656_v24, %v83_v52  ;;  %v91_v61 = vmul.f32 %v75_v19, %v63_v48 }
  0x37   :  { %409 = vmatprep.subr.bf16.mxu0 %v475_v10  ;;  %445 = vmatprep.subr.bf16.mxu1 %v475_v10  ;;  %134 = vst [vmem:[#allocation7 + $0x40] sm:$0xff] %v114_v51  ;;  %v93_v62 = vmul.f32 %v75_v19, %v65_v49  ;;  %136 = vst [vmem:[#allocation7 + $0x50] sm:$0xff] %v116_v58  ;;  %v82_v0 = vmul.f32 %v649_v18, %v54_v53 }
  0x38   :  { %310 = vmatprep.mubr.bf16.mxu0 %v143_v50  ;;  %326 = vmatprep.mubr.bf16.mxu1 %v147_v57  ;;  %v84_v1 = vmul.f32 %v649_v18, %v56_v54  ;;  %v90_v2 = vmul.f32 %v649_v18, %v62_v55  ;;  %v113_v4 = vadd.f32 %v656_v24, %v85_v59 }
  0x39   :  { %131 = vst [vmem:[#allocation7 + $0x28] sm:$0xff] %v111_v60  ;;  %v119_v5 = vadd.f32 %v656_v24, %v91_v61  ;;  %v121_v6 = vadd.f32 %v656_v24, %v93_v62  ;;  %v110_v7 = vadd.f32 %v654_v23, %v82_v0  ;;  %v92_v9 = vmul.f32 %v649_v18, %v64_v63 }
  0x3a   :  { %410 = vmatpush3.bf16.msra.mxu0 %v476_v13  ;;  %453 = vmatpush3.bf16.msra.mxu1 %v476_v13  ;;  %v112_v8 = vadd.f32 %v654_v23, %v84_v1  ;;  %133 = vst [vmem:[#allocation7 + $0x38] sm:$0xff] %v113_v4  ;;  %v118_v10 = vadd.f32 %v654_v23, %v90_v2 }
  0x3b   :  { %411 = vmatprep.subr.bf16.mxu0 %v477_v14  ;;  %446 = vmatprep.subr.bf16.mxu1 %v477_v14  ;;  %139 = vst [vmem:[#allocation7 + $0x68] sm:$0xff] %v119_v5  ;;  %141 = vst [vmem:[#allocation7 + $0x78] sm:$0xff] %v121_v6  ;;  %v142_v11 = vpack.c.bf16 %v669_v45, %v666_v44  ;;  %v146_v12 = vpack.c.bf16 %v116_v58, %v114_v51 }
  0x3c   :  { %130 = vst [vmem:[#allocation7 + $0x20] sm:$0xff] %v110_v7  ;;  %132 = vst [vmem:[#allocation7 + $0x30] sm:$0xff] %v112_v8  ;;  %v120_v13 = vadd.f32 %v654_v23, %v92_v9  ;;  %v145_v14 = vpack.c.bf16 %v113_v4, %v111_v60  ;;  %v149_v15 = vpack.c.bf16 %v121_v6, %v119_v5 }
  0x3d   :  { %138 = vst [vmem:[#allocation7 + $0x60] sm:$0xff] %v118_v10  ;;  %v144_v16 = vpack.c.bf16 %v112_v8, %v110_v7 }
  0x3e   :  { %412 = vmatpush3.bf16.msra.mxu0 %v478_v28  ;;  %454 = vmatpush3.bf16.msra.mxu1 %v478_v28  ;;  %140 = vst [vmem:[#allocation7 + $0x70] sm:$0xff] %v120_v13  ;;  %v148_v17 = vpack.c.bf16 %v120_v13, %v118_v10 }
  0x3f   :  { %413 = vmatprep.subr.bf16.mxu0 %v479_v33  ;;  %447 = vmatprep.subr.bf16.mxu1 %v479_v33 }
  0x42   :  { %414 = vmatpush3.bf16.msra.mxu0 %v480_v38  ;;  %455 = vmatpush3.bf16.msra.mxu1 %v480_v38 }
  0x43   :  { %415 = vmatprep.subr.bf16.mxu0 %v481_v56  ;;  %448 = vmatprep.subr.bf16.mxu1 %v481_v56 }
  0x46   :  { %416 = vmatpush3.bf16.msra.mxu0 %v482_v3  ;;  %456 = vmatpush3.bf16.msra.mxu1 %v482_v3 }
  0x49   :  { %311 = vmatmul.mubr.bf16.vlgmr.msra.gmra.mrb[0].mxu0 %v142_v11  ;;  %327 = vmatmul.mubr.bf16.vlgmr.msra.gmra.mrb[0].mxu1 %v146_v12 }
  0x4a   :  { %318 = vmatprep.mubr.bf16.mxu0 %v145_v14  ;;  %334 = vmatprep.mubr.bf16.mxu1 %v149_v15 }
  0x51   :  { %319 = vmatmul.mubr.bf16.gmra.mrb[4].mxu0 %v144_v16  ;;  %335 = vmatmul.mubr.bf16.gmra.mrb[4].mxu1 %v148_v17 }
  0x52   :  { %538 = shalt.err (!%p535_p6)
}
  0x53   :  { %s539_s26 = scalar_lea.hbm %s721_s4, 2048 }
  0x54   :  { %p540_p7 = scmp.ne.s32.totalorder %s721_s4, %s539_s26  ;;  %p543_p8 = scmp.lt.u32.totalorder %s539_s26, %s721_s4 }
  0x56   :  { %p545_p9 = pnand %p543_p8, %p540_p7 }
  0x58   :  { %548 = shalt.err (!%p545_p9)
}
  0x59   :  { %362 = dma.vmem_to_hbm [thread:$0]  %s357_s2, 2048, %s721_s4, [#allocation4], %s580_s28, %s580_s28, %s581_s29  }
  0x5a   :  { %s586_s10 = smov [#allocation8]  }
  0x5b   :  { %s368_s4 = sshll.u32 %s586_s10, 4  ;;  %s369_s4 = int_to_ptr.vmem [resolvable:$true] %s368_s4 }
  0x5c   :  { %s549_s28 = scalar_lea.vmem %s369_s4, 1024  ;;  %p554_p11 = scmp.lt.s32.totalorder %s369_s4, %s369_s4 }
  0x5d   :  { %p550_p10 = scmp.ne.s32.totalorder %s369_s4, %s549_s28  ;;  %p555_p12 = scmp.lt.s32.totalorder %s549_s28, %s549_s28 }
  0x5f   :  { %p556_p13 = por %p555_p12, %p554_p11 }
  0x61   :  { %p557_p0 = pnand %p556_p13, %p550_p10 }
 0x11c   :  { %v417_v18 = vpop.f32.mrb[0].mxu0  ;;  %v429_v19 = vpop.f32.mrb[0].mxu1 }
 0x11d   :  { %v418_v20 = vpop.f32.mrb[1].mxu0  ;;  %v430_v21 = vpop.f32.mrb[1].mxu1 }
 0x11e   :  { %v419_v22 = vadd.f32 %v418_v20, %v417_v18  ;;  %v431_v23 = vadd.f32 %v430_v21, %v429_v19  ;;  %v420_v24 = vpop.f32.mrb[2].mxu0  ;;  %v432_v25 = vpop.f32.mrb[2].mxu1 }
 0x11f   :  { %v421_v26 = vpop.f32.mrb[3].mxu0  ;;  %v433_v27 = vpop.f32.mrb[3].mxu1 }
 0x120   :  { %343 = vst [vmem:[#allocation8] sm:$0xff] %v419_v22  ;;  %347 = vst [vmem:[#allocation8 + $0x20] sm:$0xff] %v431_v23  ;;  %v422_v28 = vadd.f32 %v421_v26, %v420_v24  ;;  %v434_v29 = vadd.f32 %v433_v27, %v432_v25 }
 0x122   :  { %344 = vst [vmem:[#allocation8 + $0x8] sm:$0xff] %v422_v28  ;;  %348 = vst [vmem:[#allocation8 + $0x28] sm:$0xff] %v434_v29 }
 0x124   :  { %v423_v30 = vpop.f32.mrb[4].mxu0  ;;  %v435_v31 = vpop.f32.mrb[4].mxu1 }
 0x125   :  { %v424_v32 = vpop.f32.mrb[5].mxu0  ;;  %v436_v33 = vpop.f32.mrb[5].mxu1 }
 0x126   :  { %v425_v34 = vadd.f32 %v424_v32, %v423_v30  ;;  %v437_v35 = vadd.f32 %v436_v33, %v435_v31  ;;  %v426_v36 = vpop.f32.mrb[6].mxu0  ;;  %v438_v37 = vpop.f32.mrb[6].mxu1 }
 0x127   :  { %v427_v38 = vpop.f32.mrb[7].mxu0  ;;  %v439_v39 = vpop.f32.mrb[7].mxu1 }
 0x128   :  { %345 = vst [vmem:[#allocation8 + $0x10] sm:$0xff] %v425_v34  ;;  %349 = vst [vmem:[#allocation8 + $0x30] sm:$0xff] %v437_v35  ;;  %v428_v40 = vadd.f32 %v427_v38, %v426_v36  ;;  %v440_v41 = vadd.f32 %v439_v39, %v438_v37 }
 0x12a   :  { %346 = vst [vmem:[#allocation8 + $0x18] sm:$0xff] %v428_v40  ;;  %350 = vst [vmem:[#allocation8 + $0x38] sm:$0xff] %v440_v41 }
 0x12b   :  { %560 = shalt.err (!%p557_p0)
}
 0x12c   :  { %s561_s12 = scalar_lea.hbm %s722_s5, 1024 }
 0x12d   :  { %p562_p1 = scmp.ne.s32.totalorder %s722_s5, %s561_s12  ;;  %p565_p2 = scmp.lt.u32.totalorder %s561_s12, %s722_s5 }
 0x12f   :  { %p567_p3 = pnand %p565_p2, %p562_p1 }
 0x131   :  { %570 = shalt.err (!%p567_p3)
}
 0x132   :  { %s587_s0 = smov 128   ;;  %s588_s17 = smov 8  }
 0x133   :  { %374 = dma.vmem_to_hbm [thread:$0]  %s369_s4, 1024, %s722_s5, [#allocation9], %s587_s0, %s587_s0, %s588_s17  }
 0x134   :  { %575 = dma.done.wait [#allocation4], 2048  }
 0x135   :  { %576 = vsyncadd [#allocation4], 4294965248 }
 0x136   :  { %577 = dma.done.wait [#allocation9], 1024  }
 0x137   :  { %578 = vsyncadd [#allocation9], 4294966272 }
 0x138   :  { %381 = vsyncpa [#allocation3], 1 }
 0x139   :  { %382 = vsyncpa [#allocation6], 1 }
 0x13a   :  { %383 = vsyncpa [#allocation4], 1 }
 0x13b   :  { %384 = vsyncpa [#allocation9], 1 }

// kernel: tpu_custom_call.1
= control target key start
LH: loop header
LB: loop body
LE: loop exit
PB: predicated region body
PF: predicated region fallthrough
CT: control target
= control target key end

     0   :  { %11 = vsyncpa [#allocation3], 0  ;;  %s717_s0 = inlined_call_operand.hbm [shape: f32[64,256], index: 0, kind: input, shape index: {}]   ;;  %s718_s1 = inlined_call_operand.vmem [shape: f32[1,256], index: 1, kind: input, shape index: {}]   ;;  %s719_s2 = inlined_call_operand.vmem [shape: f32[1,256], index: 2, kind: input, shape index: {}]   ;;  %s720_s3 = inlined_call_operand.hbm [shape: bf16[256,128], index: 3, kind: input, shape index: {}]   ;;  %s721_s4 = inlined_call_operand.hbm [shape: f32[64,256], index: 4, kind: output, shape index: {0}]   ;;  %s722_s5 = inlined_call_operand.hbm [shape: f32[64,128], index: 5, kind: output, shape index: {1}]  }
   0x1   :  { %12 = vsyncpa [#allocation6], 0 }
   0x2   :  { %13 = vsyncpa [#allocation4], 0 }
   0x3   :  { %14 = vsyncpa [#allocation9], 0  ;;  %s579_s18 = smov [#allocation2]   ;;  %s483_s22 = scalar_lea.hbm %s717_s0, 2048 }
   0x4   :  { %s20_s19 = sshll.u32 %s579_s18, 4  ;;  %p484_p0 = scmp.ne.s32.totalorder %s717_s0, %s483_s22  ;;  %s21_s19 = int_to_ptr.vmem [resolvable:$true] %s20_s19 }
   0x5   :  { %p487_p1 = scmp.lt.u32.totalorder %s483_s22, %s717_s0 }
   0x7   :  { %p489_p2 = pnand %p487_p1, %p484_p0 }
   0x9   :  { %492 = shalt.err (!%p489_p2)
}
   0xa   :  { %s493_s27 = scalar_lea.vmem %s21_s19, 2048  ;;  %p498_p4 = scmp.lt.s32.totalorder %s21_s19, %s21_s19 }
   0xb   :  { %p494_p3 = scmp.ne.s32.totalorder %s21_s19, %s493_s27  ;;  %p499_p5 = scmp.lt.s32.totalorder %s493_s27, %s493_s27 }
   0xd   :  { %p500_p6 = por %p499_p5, %p498_p4 }
   0xf   :  { %p501_p7 = pnand %p500_p6, %p494_p3 }
  0x11   :  { %504 = shalt.err (!%p501_p7)
}
  0x12   :  { %s580_s28 = smov 256   ;;  %s581_s29 = smov 16  }
  0x13   :  { %26 = dma.hbm_to_vmem [thread:$0]  %s717_s0, 2048, %s21_s19, [#allocation3], %s580_s28, %s580_s28, %s581_s29  }
  0x14   :  { %s582_s7 = smov [#allocation5]   ;;  %s505_s11 = scalar_lea.hbm %s720_s3, 2048 }
  0x15   :  { %s36_s8 = sshll.u32 %s582_s7, 4  ;;  %p506_p8 = scmp.ne.s32.totalorder %s720_s3, %s505_s11  ;;  %s37_s8 = int_to_ptr.vmem [resolvable:$true] %s36_s8 }
  0x16   :  { %p509_p9 = scmp.lt.u32.totalorder %s505_s11, %s720_s3 }
  0x18   :  { %p511_p10 = pnand %p509_p9, %p506_p8 }
  0x1a   :  { %514 = shalt.err (!%p511_p10)
}
  0x1b   :  { %s515_s16 = scalar_lea.vmem %s37_s8, 2048  ;;  %p520_p12 = scmp.lt.s32.totalorder %s37_s8, %s37_s8 }
  0x1c   :  { %p516_p11 = scmp.ne.s32.totalorder %s37_s8, %s515_s16  ;;  %p521_p13 = scmp.lt.s32.totalorder %s515_s16, %s515_s16 }
  0x1e   :  { %p522_p0 = por %p521_p13, %p520_p12 }
  0x20   :  { %p523_p1 = pnand %p522_p0, %p516_p11 }
  0x22   :  { %526 = shalt.err (!%p523_p1)
}
  0x23   :  { %s583_s0 = smov 64   ;;  %s584_s17 = smov 4  }
  0x24   :  { %42 = dma.hbm_to_vmem [thread:$0]  %s720_s3, 2048, %s37_s8, [#allocation6], %s583_s0, %s583_s0, %s584_s17  }
  0x25   :  { %571 = dma.done.wait [#allocation3], 2048  }
  0x26   :  { %572 = vsyncadd [#allocation3], 4294965248 }
  0x27   :  { %573 = dma.done.wait [#allocation6], 2048  }
  0x28   :  { %574 = vsyncadd [#allocation6], 4294965248  ;;  %v467_v0 = vld [vmem:[#allocation5 + $0x40] sm:$0xff]   ;;  %v469_v2 = vld [vmem:[#allocation5 + $0x48] sm:$0xff]   ;;  %v68_v5 = vlaneseq }
  0x29   :  { %v468_v1 = vld [vmem:[#allocation5] sm:$0xff]   ;;  %401 = vmatprep.subr.bf16.mxu0 %v467_v0  ;;  %441 = vmatprep.subr.bf16.mxu1 %v467_v0  ;;  %v470_v3 = vld [vmem:[#allocation5 + $0x8] sm:$0xff]   ;;  %v471_v4 = vld [vmem:[#allocation5 + $0x50] sm:$0xff]  }
  0x2a   :  { %402 = vmatpush3.bf16.msra.mxu0 %v468_v1  ;;  %449 = vmatpush3.bf16.msra.mxu1 %v468_v1  ;;  %v472_v6 = vld [vmem:[#allocation5 + $0x10] sm:$0xff]   ;;  %v473_v7 = vld [vmem:[#allocation5 + $0x58] sm:$0xff]   ;;  %v69_v8 = vshrl.u32 %v68_v5, 7  ;;  %v475_v10 = vld [vmem:[#allocation5 + $0x60] sm:$0xff]  }
  0x2b   :  { %403 = vmatprep.subr.bf16.mxu0 %v469_v2  ;;  %442 = vmatprep.subr.bf16.mxu1 %v469_v2  ;;  %v474_v9 = vld [vmem:[#allocation5 + $0x18] sm:$0xff]   ;;  %v476_v13 = vld [vmem:[#allocation5 + $0x20] sm:$0xff]   ;;  %v477_v14 = vld [vmem:[#allocation5 + $0x68] sm:$0xff]  }
  0x2c   :  { %v70_v11 = vsub.s32 0, %v69_v8  ;;  %v74_v12 = vsub.s32 1, %v69_v8  ;;  %v51_v15 = vld [vmem:[#allocation2 + $0x8] sm:$0xff]  ;;  %v53_v16 = vld [vmem:[#allocation2 + $0x18] sm:$0xff]  ;;  %v66_v17 = vld [vmem:[%s718_s1] sm:$0x3] }
  0x2d   :  { %v94_v20 = vld [vmem:[%s719_s2] sm:$0x3]  ;;  %v59_v21 = vld [vmem:[#allocation2 + $0x48] sm:$0xff]  ;;  %v61_v22 = vld [vmem:[#allocation2 + $0x58] sm:$0xff]  ;;  %s585_s1 = smov [#allocation7]  }
  0x2e   :  { %404 = vmatpush3.bf16.msra.mxu0 %v470_v3  ;;  %450 = vmatpush3.bf16.msra.mxu1 %v470_v3  ;;  %v649_v18 = vrot.slane %v66_v17, %v70_v11  ;;  %v75_v19 = vrot.slane %v66_v17, %v74_v12  ;;  %v654_v23 = vrot.slane %v94_v20, %v70_v11  ;;  %v50_v25 = vld [vmem:[#allocation2] sm:$0xff]  ;;  %v52_v26 = vld [vmem:[#allocation2 + $0x10] sm:$0xff]  ;;  %v478_v28 = vld [vmem:[#allocation5 + $0x28] sm:$0xff]   ;;  %s356_s2 = sshll.u32 %s585_s1, 4  ;;  %s357_s2 = int_to_ptr.vmem [resolvable:$true] %s356_s2 }
  0x2f   :  { %405 = vmatprep.subr.bf16.mxu0 %v471_v4  ;;  %443 = vmatprep.subr.bf16.mxu1 %v471_v4  ;;  %v656_v24 = vrot.slane %v94_v20, %v74_v12  ;;  %v58_v27 = vld [vmem:[#allocation2 + $0x40] sm:$0xff]  ;;  %v60_v32 = vld [vmem:[#allocation2 + $0x50] sm:$0xff]  ;;  %v55_v37 = vld [vmem:[#allocation2 + $0x28] sm:$0xff]  ;;  %s527_s23 = scalar_lea.vmem %s357_s2, 2048  ;;  %p532_p3 = scmp.lt.s32.totalorder %s357_s2, %s357_s2 }
  0x30   :  { %v79_v29 = vmul.f32 %v75_v19, %v51_v15  ;;  %v81_v30 = vmul.f32 %v75_v19, %v53_v16  ;;  %v87_v31 = vmul.f32 %v75_v19, %v59_v21  ;;  %v479_v33 = vld [vmem:[#allocation5 + $0x70] sm:$0xff]   ;;  %v89_v34 = vmul.f32 %v75_v19, %v61_v22  ;;  %v57_v47 = vld [vmem:[#allocation2 + $0x38] sm:$0xff]  ;;  %v63_v48 = vld [vmem:[#allocation2 + $0x68] sm:$0xff]  ;;  %p528_p2 = scmp.ne.s32.totalorder %s357_s2, %s527_s23  ;;  %p533_p4 = scmp.lt.s32.totalorder %s527_s23, %s527_s23 }
  0x31   :  { %v78_v35 = vmul.f32 %v649_v18, %v50_v25  ;;  %v80_v36 = vmul.f32 %v649_v18, %v52_v26  ;;  %v480_v38 = vld [vmem:[#allocation5 + $0x30] sm:$0xff]   ;;  %v86_v42 = vmul.f32 %v649_v18, %v58_v27  ;;  %v88_v46 = vmul.f32 %v649_v18, %v60_v32  ;;  %v65_v49 = vld [vmem:[#allocation2 + $0x78] sm:$0xff]  ;;  %v54_v53 = vld [vmem:[#allocation2 + $0x20] sm:$0xff] }
  0x32   :  { %406 = vmatpush3.bf16.msra.mxu0 %v472_v6  ;;  %451 = vmatpush3.bf16.msra.mxu1 %v472_v6  ;;  %v107_v39 = vadd.f32 %v656_v24, %v79_v29  ;;  %v109_v40 = vadd.f32 %v656_v24, %v81_v30  ;;  %v115_v41 = vadd.f32 %v656_v24, %v87_v31  ;;  %v56_v54 = vld [vmem:[#allocation2 + $0x30] sm:$0xff]  ;;  %v62_v55 = vld [vmem:[#allocation2 + $0x60] sm:$0xff]  ;;  %v481_v56 = vld [vmem:[#allocation5 + $0x78] sm:$0xff]   ;;  %p534_p5 = por %p533_p4, %p532_p3 }
  0x33   :  { %407 = vmatprep.subr.bf16.mxu0 %v473_v7  ;;  %444 = vmatprep.subr.bf16.mxu1 %v473_v7  ;;  %v117_v43 = vadd.f32 %v656_v24, %v89_v34  ;;  %v666_v44 = vadd.f32 %v654_v23, %v78_v35  ;;  %v669_v45 = vadd.f32 %v654_v23, %v80_v36  ;;  %v64_v63 = vld [vmem:[#allocation2 + $0x70] sm:$0xff]  ;;  %v482_v3 = vld [vmem:[#allocation5 + $0x38] sm:$0xff]  }
  0x34   :  { %127 = vst [vmem:[#allocation7 + $0x8] sm:$0xff] %v107_v39  ;;  %129 = vst [vmem:[#allocation7 + $0x18] sm:$0xff] %v109_v40  ;;  %v143_v50 = vpack.c.bf16 %v109_v40, %v107_v39  ;;  %v114_v51 = vadd.f32 %v654_v23, %v86_v42  ;;  %v83_v52 = vmul.f32 %v75_v19, %v55_v37  ;;  %p535_p6 = pnand %p534_p5, %p528_p2 }
  0x35   :  { %135 = vst [vmem:[#allocation7 + $0x48] sm:$0xff] %v115_v41  ;;  %137 = vst [vmem:[#allocation7 + $0x58] sm:$0xff] %v117_v43  ;;  %v147_v57 = vpack.c.bf16 %v117_v43, %v115_v41  ;;  %v116_v58 = vadd.f32 %v654_v23, %v88_v46  ;;  %v85_v59 = vmul.f32 %v75_v19, %v57_v47 }
  0x36   :  { %408 = vmatpush3.bf16.msra.mxu0 %v474_v9  ;;  %452 = vmatpush3.bf16.msra.mxu1 %v474_v9  ;;  %126 = vst [vmem:[#allocation7] sm:$0xff] %v666_v44  ;;  %128 = vst [vmem:[#allocation7 + $0x10] sm:$0xff] %v669_v45  ;;  %v111_v60 = vadd.f32 %v656_v24, %v83_v52  ;;  %v91_v61 = vmul.f32 %v75_v19, %v63_v48 }
  0x37   :  { %409 = vmatprep.subr.bf16.mxu0 %v475_v10  ;;  %445 = vmatprep.subr.bf16.mxu1 %v475_v10  ;;  %134 = vst [vmem:[#allocation7 + $0x40] sm:$0xff] %v114_v51  ;;  %v93_v62 = vmul.f32 %v75_v19, %v65_v49  ;;  %136 = vst [vmem:[#allocation7 + $0x50] sm:$0xff] %v116_v58  ;;  %v82_v0 = vmul.f32 %v649_v18, %v54_v53 }
  0x38   :  { %310 = vmatprep.mubr.bf16.mxu0 %v143_v50  ;;  %326 = vmatprep.mubr.bf16.mxu1 %v147_v57  ;;  %v84_v1 = vmul.f32 %v649_v18, %v56_v54  ;;  %v90_v2 = vmul.f32 %v649_v18, %v62_v55  ;;  %v113_v4 = vadd.f32 %v656_v24, %v85_v59 }
  0x39   :  { %131 = vst [vmem:[#allocation7 + $0x28] sm:$0xff] %v111_v60  ;;  %v119_v5 = vadd.f32 %v656_v24, %v91_v61  ;;  %v121_v6 = vadd.f32 %v656_v24, %v93_v62  ;;  %v110_v7 = vadd.f32 %v654_v23, %v82_v0  ;;  %v92_v9 = vmul.f32 %v649_v18, %v64_v63 }
  0x3a   :  { %410 = vmatpush3.bf16.msra.mxu0 %v476_v13  ;;  %453 = vmatpush3.bf16.msra.mxu1 %v476_v13  ;;  %v112_v8 = vadd.f32 %v654_v23, %v84_v1  ;;  %133 = vst [vmem:[#allocation7 + $0x38] sm:$0xff] %v113_v4  ;;  %v118_v10 = vadd.f32 %v654_v23, %v90_v2 }
  0x3b   :  { %411 = vmatprep.subr.bf16.mxu0 %v477_v14  ;;  %446 = vmatprep.subr.bf16.mxu1 %v477_v14  ;;  %139 = vst [vmem:[#allocation7 + $0x68] sm:$0xff] %v119_v5  ;;  %141 = vst [vmem:[#allocation7 + $0x78] sm:$0xff] %v121_v6  ;;  %v142_v11 = vpack.c.bf16 %v669_v45, %v666_v44  ;;  %v146_v12 = vpack.c.bf16 %v116_v58, %v114_v51 }
  0x3c   :  { %130 = vst [vmem:[#allocation7 + $0x20] sm:$0xff] %v110_v7  ;;  %132 = vst [vmem:[#allocation7 + $0x30] sm:$0xff] %v112_v8  ;;  %v120_v13 = vadd.f32 %v654_v23, %v92_v9  ;;  %v145_v14 = vpack.c.bf16 %v113_v4, %v111_v60  ;;  %v149_v15 = vpack.c.bf16 %v121_v6, %v119_v5 }
  0x3d   :  { %138 = vst [vmem:[#allocation7 + $0x60] sm:$0xff] %v118_v10  ;;  %v144_v16 = vpack.c.bf16 %v112_v8, %v110_v7 }
  0x3e   :  { %412 = vmatpush3.bf16.msra.mxu0 %v478_v28  ;;  %454 = vmatpush3.bf16.msra.mxu1 %v478_v28  ;;  %140 = vst [vmem:[#allocation7 + $0x70] sm:$0xff] %v120_v13  ;;  %v148_v17 = vpack.c.bf16 %v120_v13, %v118_v10 }
  0x3f   :  { %413 = vmatprep.subr.bf16.mxu0 %v479_v33  ;;  %447 = vmatprep.subr.bf16.mxu1 %v479_v33 }
  0x42   :  { %414 = vmatpush3.bf16.msra.mxu0 %v480_v38  ;;  %455 = vmatpush3.bf16.msra.mxu1 %v480_v38 }
  0x43   :  { %415 = vmatprep.subr.bf16.mxu0 %v481_v56  ;;  %448 = vmatprep.subr.bf16.mxu1 %v481_v56 }
  0x46   :  { %416 = vmatpush3.bf16.msra.mxu0 %v482_v3  ;;  %456 = vmatpush3.bf16.msra.mxu1 %v482_v3 }
  0x49   :  { %311 = vmatmul.mubr.bf16.vlgmr.msra.gmra.mrb[0].mxu0 %v142_v11  ;;  %327 = vmatmul.mubr.bf16.vlgmr.msra.gmra.mrb[0].mxu1 %v146_v12 }
  0x4a   :  { %318 = vmatprep.mubr.bf16.mxu0 %v145_v14  ;;  %334 = vmatprep.mubr.bf16.mxu1 %v149_v15 }
  0x51   :  { %319 = vmatmul.mubr.bf16.gmra.mrb[4].mxu0 %v144_v16  ;;  %335 = vmatmul.mubr.bf16.gmra.mrb[4].mxu1 %v148_v17 }
  0x52   :  { %538 = shalt.err (!%p535_p6)
}
  0x53   :  { %s539_s26 = scalar_lea.hbm %s721_s4, 2048 }
  0x54   :  { %p540_p7 = scmp.ne.s32.totalorder %s721_s4, %s539_s26  ;;  %p543_p8 = scmp.lt.u32.totalorder %s539_s26, %s721_s4 }
  0x56   :  { %p545_p9 = pnand %p543_p8, %p540_p7 }
  0x58   :  { %548 = shalt.err (!%p545_p9)
}
  0x59   :  { %362 = dma.vmem_to_hbm [thread:$0]  %s357_s2, 2048, %s721_s4, [#allocation4], %s580_s28, %s580_s28, %s581_s29  }
  0x5a   :  { %s586_s10 = smov [#allocation8]  }
  0x5b   :  { %s368_s4 = sshll.u32 %s586_s10, 4  ;;  %s369_s4 = int_to_ptr.vmem [resolvable:$true] %s368_s4 }
  0x5c   :  { %s549_s28 = scalar_lea.vmem %s369_s4, 1024  ;;  %p554_p11 = scmp.lt.s32.totalorder %s369_s4, %s369_s4 }
  0x5d   :  { %p550_p10 = scmp.ne.s32.totalorder %s369_s4, %s549_s28  ;;  %p555_p12 = scmp.lt.s32.totalorder %s549_s28, %s549_s28 }
  0x5f   :  { %p556_p13 = por %p555_p12, %p554_p11 }
  0x61   :  { %p557_p0 = pnand %p556_p13, %p550_p10 }
 0x11c   :  { %v417_v18 = vpop.f32.mrb[0].mxu0  ;;  %v429_v19 = vpop.f32.mrb[0].mxu1 }
 0x11d   :  { %v418_v20 = vpop.f32.mrb[1].mxu0  ;;  %v430_v21 = vpop.f32.mrb[1].mxu1 }
 0x11e   :  { %v419_v22 = vadd.f32 %v418_v20, %v417_v18  ;;  %v431_v23 = vadd.f32 %v430_v21, %v429_v19  ;;  %v420_v24 = vpop.f32.mrb[2].mxu0  ;;  %v432_v25 = vpop.f32.mrb[2].mxu1 }
 0x11f   :  { %v421_v26 = vpop.f32.mrb[3].mxu0  ;;  %v433_v27 = vpop.f32.mrb[3].mxu1 }
 0x120   :  { %343 = vst [vmem:[#allocation8] sm:$0xff] %v419_v22  ;;  %347 = vst [vmem:[#allocation8 + $0x20] sm:$0xff] %v431_v23  ;;  %v422_v28 = vadd.f32 %v421_v26, %v420_v24  ;;  %v434_v29 = vadd.f32 %v433_v27, %v432_v25 }
 0x122   :  { %344 = vst [vmem:[#allocation8 + $0x8] sm:$0xff] %v422_v28  ;;  %348 = vst [vmem:[#allocation8 + $0x28] sm:$0xff] %v434_v29 }
 0x124   :  { %v423_v30 = vpop.f32.mrb[4].mxu0  ;;  %v435_v31 = vpop.f32.mrb[4].mxu1 }
 0x125   :  { %v424_v32 = vpop.f32.mrb[5].mxu0  ;;  %v436_v33 = vpop.f32.mrb[5].mxu1 }
 0x126   :  { %v425_v34 = vadd.f32 %v424_v32, %v423_v30  ;;  %v437_v35 = vadd.f32 %v436_v33, %v435_v31  ;;  %v426_v36 = vpop.f32.mrb[6].mxu0  ;;  %v438_v37 = vpop.f32.mrb[6].mxu1 }
 0x127   :  { %v427_v38 = vpop.f32.mrb[7].mxu0  ;;  %v439_v39 = vpop.f32.mrb[7].mxu1 }
 0x128   :  { %345 = vst [vmem:[#allocation8 + $0x10] sm:$0xff] %v425_v34  ;;  %349 = vst [vmem:[#allocation8 + $0x30] sm:$0xff] %v437_v35  ;;  %v428_v40 = vadd.f32 %v427_v38, %v426_v36  ;;  %v440_v41 = vadd.f32 %v439_v39, %v438_v37 }
 0x12a   :  { %346 = vst [vmem:[#allocation8 + $0x18] sm:$0xff] %v428_v40  ;;  %350 = vst [vmem:[#allocation8 + $0x38] sm:$0xff] %v440_v41 }
 0x12b   :  { %560 = shalt.err (!%p557_p0)
}
 0x12c   :  { %s561_s12 = scalar_lea.hbm %s722_s5, 1024 }
 0x12d   :  { %p562_p1 = scmp.ne.s32.totalorder %s722_s5, %s561_s12  ;;  %p565_p2 = scmp.lt.u32.totalorder %s561_s12, %s722_s5 }
 0x12f   :  { %p567_p3 = pnand %p565_p2, %p562_p1 }
 0x131   :  { %570 = shalt.err (!%p567_p3)
}
 0x132   :  { %s587_s0 = smov 128   ;;  %s588_s17 = smov 8  }
 0x133   :  { %374 = dma.vmem_to_hbm [thread:$0]  %s369_s4, 1024, %s722_s5, [#allocation9], %s587_s0, %s587_s0, %s588_s17  }
 0x134   :  { %575 = dma.done.wait [#allocation4], 2048  }
 0x135   :  { %576 = vsyncadd [#allocation4], 4294965248 }
 0x136   :  { %577 = dma.done.wait [#allocation9], 1024  }
 0x137   :  { %578 = vsyncadd [#allocation9], 4294966272 }
 0x138   :  { %381 = vsyncpa [#allocation3], 1 }
 0x139   :  { %382 = vsyncpa [#allocation6], 1 }
 0x13a   :  { %383 = vsyncpa [#allocation4], 1 }
 0x13b   :  { %384 = vsyncpa [#allocation9], 1 }

</bundles_post_ra>
